<compile_context>
chip_gen: v5e
topology: v5e:2x2
jax: 0.10.0
libtpu: 0.0.40
codegen_flags: <defaults>
</compile_context>

<pallas_src>
import functools

import jax
import jax.numpy as jnp
import numpy as np
from jax import lax
from jax.experimental import pallas as pl
from jax.experimental.pallas import tpu as pltpu


def _toeplitz_weights(w_hwio, W):
    """(3, 3, Cin, Cout) HWIO -> (3, W*Cin, W*Cout) banded GEMM weights.

    Wd[dy, xi*Cin+ci, xo*Cout+co] = w[dy, xi-xo+1, ci, co] if |xi-xo| <= 1
    else 0.  The zero band implements the width-direction 'SAME' padding, so
    the kernel only needs height-direction halo rows.
    """
    kH, kW, Cin, Cout = w_hwio.shape
    T = np.zeros((kW, W, W), np.float32)
    for dx in range(kW):
        for xo in range(W):
            xi = xo + dx - 1  # padding = 1
            if 0 <= xi < W:
                T[dx, xi, xo] = 1.0
    wd = jnp.einsum("dio,adce->aicoe", jnp.asarray(T), w_hwio)
    return wd.reshape(kH, W * Cin, W * Cout)


def _basic_block_kernel(x_ref, w1_ref, sh1_ref, w2_ref, sh2_ref,
                        out_ref, xpad_ref, mid_ref):
    """One batch element per grid step.

    x_ref   : (H, W*Cin)          f32   input rows (NHWC flattened over W,C)
    w1_ref  : (3, W*Cin, W*Cout)  bf16  conv1 banded weights (BN1 scale folded)
    sh1_ref : (1, W*Cout)         f32   BN1 shift, tiled over W
    w2_ref  : (3, W*Cout, W*Cout) bf16  conv2 banded weights (BN2 scale folded)
    sh2_ref : (1, W*Cout)         f32   BN2 shift, tiled over W
    out_ref : (H, W*Cout)         f32
    xpad_ref: (H+2, W*Cin)        bf16  VMEM scratch, height-halo rows zero
    mid_ref : (H+2, W*Cout)       bf16  VMEM scratch, height-halo rows zero
    """
    H = x_ref.shape[0]

    # Zero only the two halo rows (cheap, per-step -> safe under "parallel").
    zin = jnp.zeros((1, xpad_ref.shape[1]), xpad_ref.dtype)
    xpad_ref[0:1, :] = zin
    xpad_ref[H + 1:H + 2, :] = zin
    zmid = jnp.zeros((1, mid_ref.shape[1]), mid_ref.dtype)
    mid_ref[0:1, :] = zmid
    mid_ref[H + 1:H + 2, :] = zmid

    x = x_ref[...]                                        # f32, exact residual
    xpad_ref[1:1 + H, :] = x.astype(xpad_ref.dtype)       # bf16 for the MXU

    def conv_rows(src_ref, w_ref):
        # 3 banded GEMMs (one per kernel row), f32 accumulation on the MXU.
        acc = jnp.dot(src_ref[0:H, :], w_ref[0],
                      preferred_element_type=jnp.float32)
        for dy in (1, 2):
            acc += jnp.dot(src_ref[dy:dy + H, :], w_ref[dy],
                           preferred_element_type=jnp.float32)
        return acc

    # conv1 -> bn1 (shift only; scale folded into weights) -> relu
    acc1 = conv_rows(xpad_ref, w1_ref)
    mid = jnp.maximum(acc1 + sh1_ref[...], 0.0)
    mid_ref[1:1 + H, :] = mid.astype(mid_ref.dtype)

    # conv2 -> bn2 -> residual add -> relu  (all in f32)
    acc2 = conv_rows(mid_ref, w2_ref)
    y = jnp.maximum(acc2 + sh2_ref[...] + x, 0.0)
    out_ref[...] = y.astype(out_ref.dtype)                # lane-dense store


@functools.partial(jax.jit, static_argnames=("eps",))
def basic_block_pallas(x_nchw, w1, g1, b1, m1, v1, w2, g2, b2, m2, v2,
                       eps=1e-5):
    """ResNet BasicBlock forward (stride=1, downsample=None), NCHW in/out."""
    x = jnp.transpose(x_nchw, (0, 2, 3, 1)).astype(jnp.float32)   # -> NHWC
    N, H, W, Cin = x.shape
    Cout = w1.shape[-1]
    assert Cin == Cout, "identity residual requires inplanes == planes"

    # Fold BatchNorm (inference) into per-channel scale/shift; fold the scale
    # into the conv weights (conv(x, w) * s == conv(x, w * s)).
    s1 = g1 / jnp.sqrt(v1 + eps)
    sh1 = b1 - m1 * s1
    s2 = g2 / jnp.sqrt(v2 + eps)
    sh2 = b2 - m2 * s2

    w1s = w1 * s1[None, None, None, :]
    w2s = w2 * s2[None, None, None, :]

    w1d = _toeplitz_weights(w1s, W).astype(jnp.bfloat16)   # (3, W*Cin, W*Cout)
    w2d = _toeplitz_weights(w2s, W).astype(jnp.bfloat16)   # (3, W*Cout, W*Cout)

    sh1_t = jnp.tile(sh1, W).reshape(1, W * Cout).astype(jnp.float32)
    sh2_t = jnp.tile(sh2, W).reshape(1, W * Cout).astype(jnp.float32)

    x2d = x.reshape(N, H, W * Cin)                         # free metadata view

    out2d = pl.pallas_call(
        _basic_block_kernel,
        out_shape=jax.ShapeDtypeStruct((N, H, W * Cout), jnp.float32),
        grid_spec=pltpu.PrefetchScalarGridSpec(
            num_scalar_prefetch=0,
            grid=(N,),
            in_specs=[
                pl.BlockSpec((None, H, W * Cin), lambda n: (n, 0, 0)),
                pl.BlockSpec((3, W * Cin, W * Cout), lambda n: (0, 0, 0)),
                pl.BlockSpec((1, W * Cout), lambda n: (0, 0)),
                pl.BlockSpec((3, W * Cout, W * Cout), lambda n: (0, 0, 0)),
                pl.BlockSpec((1, W * Cout), lambda n: (0, 0)),
            ],
            out_specs=pl.BlockSpec((None, H, W * Cout), lambda n: (n, 0, 0)),
            scratch_shapes=[
                pltpu.VMEM((H + 2, W * Cin), jnp.bfloat16),
                pltpu.VMEM((H + 2, W * Cout), jnp.bfloat16),
            ],
        ),
        compiler_params=pltpu.CompilerParams(
            dimension_semantics=("parallel",),
            vmem_limit_bytes=32 * 1024 * 1024,
        ),
    )(x2d, w1d, sh1_t, w2d, sh2_t)

    out = out2d.reshape(N, H, W, Cout)
    return jnp.transpose(out, (0, 3, 1, 2))                # -> NCHW


def basic_block_reference(x_nchw, w1, g1, b1, m1, v1, w2, g2, b2, m2, v2,
                          eps=1e-5):
    """Pure-JAX f32 reference (inference-mode BN), NCHW in/out."""
    x = jnp.transpose(x_nchw, (0, 2, 3, 1)).astype(jnp.float32)
    dn = ("NHWC", "HWIO", "NHWC")
    y = lax.conv_general_dilated(x, w1, (1, 1), "SAME", dimension_numbers=dn)
    y = (y - m1) / jnp.sqrt(v1 + eps) * g1 + b1
    y = jnp.maximum(y, 0.0)
    y = lax.conv_general_dilated(y, w2, (1, 1), "SAME", dimension_numbers=dn)
    y = (y - m2) / jnp.sqrt(v2 + eps) * g2 + b2
    y = jnp.maximum(y + x, 0.0)
    return jnp.transpose(y, (0, 3, 1, 2))


if __name__ == "__main__":
    # Small deterministic configuration: inplanes = planes = 4, stride = 1.
    N, C, H, W = 2, 4, 16, 16
    key = jax.random.PRNGKey(0)
    ks = jax.random.split(key, 8)

    x = jax.random.normal(ks[0], (N, C, H, W), jnp.float32)

    # conv weights in HWIO layout (3, 3, Cin, Cout)
    w1 = jax.random.normal(ks[1], (3, 3, C, C), jnp.float32) * 0.1
    w2 = jax.random.normal(ks[2], (3, 3, C, C), jnp.float32) * 0.1

    # BatchNorm params / running stats (deterministic, non-trivial)
    g1 = 1.0 + 0.1 * jax.random.normal(ks[3], (C,), jnp.float32)
    b1 = 0.1 * jax.random.normal(ks[4], (C,), jnp.float32)
    m1 = 0.05 * jnp.arange(C, dtype=jnp.float32)
    v1 = 1.0 + 0.1 * jnp.arange(C, dtype=jnp.float32)

    g2 = 1.0 + 0.1 * jax.random.normal(ks[5], (C,), jnp.float32)
    b2 = 0.1 * jax.random.normal(ks[6], (C,), jnp.float32)
    m2 = -0.03 * jnp.arange(C, dtype=jnp.float32)
    v2 = 1.0 + 0.05 * jnp.arange(C, dtype=jnp.float32)

    out = basic_block_pallas(x, w1, g1, b1, m1, v1, w2, g2, b2, m2, v2)
    out = jax.block_until_ready(out)

    ref = basic_block_reference(x, w1, g1, b1, m1, v1, w2, g2, b2, m2, v2)
    # Tolerance reflects bf16 MXU inputs (accumulation / BN shift / residual /
    # ReLU are still f32) compared against a pure-f32 reference.
    np.testing.assert_allclose(np.asarray(out), np.asarray(ref),
                               rtol=5e-2, atol=5e-2)

    print("KERNEL_OK")
</pallas_src>

<mosaic_0001>
module attributes {stable_mosaic.version = 11 : i64} {
  func.func @_basic_block_kernel(%arg0: i32, %arg1: memref<1x16x64xf32, #tpu.memory_space<vmem>>, %arg2: memref<3x64x64xbf16, #tpu.memory_space<vmem>>, %arg3: memref<1x64xf32, #tpu.memory_space<vmem>>, %arg4: memref<3x64x64xbf16, #tpu.memory_space<vmem>>, %arg5: memref<1x64xf32, #tpu.memory_space<vmem>>, %arg6: memref<1x16x64xf32, #tpu.memory_space<vmem>>, %arg7: memref<18x64xbf16, #tpu.memory_space<vmem>>, %arg8: memref<18x64xbf16, #tpu.memory_space<vmem>>) attributes {dimension_semantics = [#tpu.dimension_semantics<parallel>], iteration_bounds = array<i64: 2>, scalar_prefetch = 0 : i64, scratch_operands = 2 : i64, tpu.core_type = #tpu.core_type<tc>, window_params = [{transform_indices = @transform_0, window_bounds = array<i64: 1, 16, 64>}, {pipeline_mode = #tpu.pipeline_mode<synchronous>, transform_indices = @transform_1, window_bounds = array<i64: 3, 64, 64>}, {pipeline_mode = #tpu.pipeline_mode<synchronous>, transform_indices = @transform_2, window_bounds = array<i64: 1, 64>}, {pipeline_mode = #tpu.pipeline_mode<synchronous>, transform_indices = @transform_3, window_bounds = array<i64: 3, 64, 64>}, {pipeline_mode = #tpu.pipeline_mode<synchronous>, transform_indices = @transform_4, window_bounds = array<i64: 1, 64>}, {transform_indices = @transform_5, window_bounds = array<i64: 1, 16, 64>}]} {
    %cst = arith.constant 0.000000e+00 : bf16
    %0 = vector.broadcast %cst : bf16 to vector<1x64xbf16>
    %c0 = arith.constant 0 : index
    %c0_0 = arith.constant 0 : index
    %1 = vector.load %arg7[%c0, %c0_0] : memref<18x64xbf16, #tpu.memory_space<vmem>>, vector<1x64xbf16>
    tpu.vector_store %arg7[%c0, %c0_0], %0 {strides = array<i32>} : memref<18x64xbf16, #tpu.memory_space<vmem>>, vector<1x64xbf16>,
    %c17 = arith.constant 17 : index
    %c0_1 = arith.constant 0 : index
    %2 = vector.load %arg7[%c17, %c0_1] : memref<18x64xbf16, #tpu.memory_space<vmem>>, vector<1x64xbf16>
    tpu.vector_store %arg7[%c17, %c0_1], %0 {strides = array<i32>} : memref<18x64xbf16, #tpu.memory_space<vmem>>, vector<1x64xbf16>,
    %cst_2 = arith.constant 0.000000e+00 : bf16
    %3 = vector.broadcast %cst_2 : bf16 to vector<1x64xbf16>
    %c0_3 = arith.constant 0 : index
    %c0_4 = arith.constant 0 : index
    %4 = vector.load %arg8[%c0_3, %c0_4] : memref<18x64xbf16, #tpu.memory_space<vmem>>, vector<1x64xbf16>
    tpu.vector_store %arg8[%c0_3, %c0_4], %3 {strides = array<i32>} : memref<18x64xbf16, #tpu.memory_space<vmem>>, vector<1x64xbf16>,
    %c17_5 = arith.constant 17 : index
    %c0_6 = arith.constant 0 : index
    %5 = vector.load %arg8[%c17_5, %c0_6] : memref<18x64xbf16, #tpu.memory_space<vmem>>, vector<1x64xbf16>
    tpu.vector_store %arg8[%c17_5, %c0_6], %3 {strides = array<i32>} : memref<18x64xbf16, #tpu.memory_space<vmem>>, vector<1x64xbf16>,
    %c0_7 = arith.constant 0 : index
    %c0_8 = arith.constant 0 : index
    %c0_9 = arith.constant 0 : index
    %6 = vector.load %arg1[%c0_7, %c0_8, %c0_9] : memref<1x16x64xf32, #tpu.memory_space<vmem>>, vector<1x16x64xf32>
    %7 = vector.shape_cast %6 : vector<1x16x64xf32> to vector<16x64xf32>
    %8 = arith.truncf %7 : vector<16x64xf32> to vector<16x64xbf16>
    %c1 = arith.constant 1 : index
    %c0_10 = arith.constant 0 : index
    %9 = vector.load %arg7[%c1, %c0_10] : memref<18x64xbf16, #tpu.memory_space<vmem>>, vector<16x64xbf16>
    tpu.vector_store %arg7[%c1, %c0_10], %8 {strides = array<i32>} : memref<18x64xbf16, #tpu.memory_space<vmem>>, vector<16x64xbf16>,
    %c0_11 = arith.constant 0 : index
    %c0_12 = arith.constant 0 : index
    %10 = vector.load %arg7[%c0_11, %c0_12] : memref<18x64xbf16, #tpu.memory_space<vmem>>, vector<16x64xbf16>
    %c0_13 = arith.constant 0 : index
    %c0_14 = arith.constant 0 : index
    %c0_15 = arith.constant 0 : index
    %11 = vector.load %arg2[%c0_13, %c0_14, %c0_15] : memref<3x64x64xbf16, #tpu.memory_space<vmem>>, vector<1x64x64xbf16>
    %12 = vector.shape_cast %11 : vector<1x64x64xbf16> to vector<64x64xbf16>
    %cst_16 = arith.constant dense<0.000000e+00> : vector<16x64xf32>
    %13 = tpu.matmul %10, %12, %cst_16 {dimension_numbers = #tpu.dot_dimension_numbers<[1], [0], [0], [1], [0, 0, 1, 1], [], []>} : vector<16x64xbf16>, vector<64x64xbf16>, vector<16x64xf32> -> vector<16x64xf32>
    %c1_17 = arith.constant 1 : index
    %c0_18 = arith.constant 0 : index
    %14 = vector.load %arg7[%c1_17, %c0_18] : memref<18x64xbf16, #tpu.memory_space<vmem>>, vector<16x64xbf16>
    %c1_19 = arith.constant 1 : index
    %c0_20 = arith.constant 0 : index
    %c0_21 = arith.constant 0 : index
    %15 = vector.load %arg2[%c1_19, %c0_20, %c0_21] : memref<3x64x64xbf16, #tpu.memory_space<vmem>>, vector<1x64x64xbf16>
    %16 = vector.shape_cast %15 : vector<1x64x64xbf16> to vector<64x64xbf16>
    %cst_22 = arith.constant dense<0.000000e+00> : vector<16x64xf32>
    %17 = tpu.matmul %14, %16, %cst_22 {dimension_numbers = #tpu.dot_dimension_numbers<[1], [0], [0], [1], [0, 0, 1, 1], [], []>} : vector<16x64xbf16>, vector<64x64xbf16>, vector<16x64xf32> -> vector<16x64xf32>
    %18 = arith.addf %13, %17 : vector<16x64xf32>
    %c2 = arith.constant 2 : index
    %c0_23 = arith.constant 0 : index
    %19 = vector.load %arg7[%c2, %c0_23] : memref<18x64xbf16, #tpu.memory_space<vmem>>, vector<16x64xbf16>
    %c2_24 = arith.constant 2 : index
    %c0_25 = arith.constant 0 : index
    %c0_26 = arith.constant 0 : index
    %20 = vector.load %arg2[%c2_24, %c0_25, %c0_26] : memref<3x64x64xbf16, #tpu.memory_space<vmem>>, vector<1x64x64xbf16>
    %21 = vector.shape_cast %20 : vector<1x64x64xbf16> to vector<64x64xbf16>
    %cst_27 = arith.constant dense<0.000000e+00> : vector<16x64xf32>
    %22 = tpu.matmul %19, %21, %cst_27 {dimension_numbers = #tpu.dot_dimension_numbers<[1], [0], [0], [1], [0, 0, 1, 1], [], []>} : vector<16x64xbf16>, vector<64x64xbf16>, vector<16x64xf32> -> vector<16x64xf32>
    %23 = arith.addf %18, %22 : vector<16x64xf32>
    %c0_28 = arith.constant 0 : index
    %c0_29 = arith.constant 0 : index
    %24 = vector.load %arg3[%c0_28, %c0_29] : memref<1x64xf32, #tpu.memory_space<vmem>>, vector<1x64xf32>
    %25 = vector.broadcast %24 : vector<1x64xf32> to vector<16x64xf32>
    %26 = arith.addf %23, %25 : vector<16x64xf32>
    %cst_30 = arith.constant 0.000000e+00 : f32
    %27 = vector.broadcast %cst_30 : f32 to vector<16x64xf32>
    %28 = arith.maximumf %26, %27 : vector<16x64xf32>
    %29 = arith.truncf %28 : vector<16x64xf32> to vector<16x64xbf16>
    %c1_31 = arith.constant 1 : index
    %c0_32 = arith.constant 0 : index
    %30 = vector.load %arg8[%c1_31, %c0_32] : memref<18x64xbf16, #tpu.memory_space<vmem>>, vector<16x64xbf16>
    tpu.vector_store %arg8[%c1_31, %c0_32], %29 {strides = array<i32>} : memref<18x64xbf16, #tpu.memory_space<vmem>>, vector<16x64xbf16>,
    %c0_33 = arith.constant 0 : index
    %c0_34 = arith.constant 0 : index
    %31 = vector.load %arg8[%c0_33, %c0_34] : memref<18x64xbf16, #tpu.memory_space<vmem>>, vector<16x64xbf16>
    %c0_35 = arith.constant 0 : index
    %c0_36 = arith.constant 0 : index
    %c0_37 = arith.constant 0 : index
    %32 = vector.load %arg4[%c0_35, %c0_36, %c0_37] : memref<3x64x64xbf16, #tpu.memory_space<vmem>>, vector<1x64x64xbf16>
    %33 = vector.shape_cast %32 : vector<1x64x64xbf16> to vector<64x64xbf16>
    %cst_38 = arith.constant dense<0.000000e+00> : vector<16x64xf32>
    %34 = tpu.matmul %31, %33, %cst_38 {dimension_numbers = #tpu.dot_dimension_numbers<[1], [0], [0], [1], [0, 0, 1, 1], [], []>} : vector<16x64xbf16>, vector<64x64xbf16>, vector<16x64xf32> -> vector<16x64xf32>
    %c1_39 = arith.constant 1 : index
    %c0_40 = arith.constant 0 : index
    %35 = vector.load %arg8[%c1_39, %c0_40] : memref<18x64xbf16, #tpu.memory_space<vmem>>, vector<16x64xbf16>
    %c1_41 = arith.constant 1 : index
    %c0_42 = arith.constant 0 : index
    %c0_43 = arith.constant 0 : index
    %36 = vector.load %arg4[%c1_41, %c0_42, %c0_43] : memref<3x64x64xbf16, #tpu.memory_space<vmem>>, vector<1x64x64xbf16>
    %37 = vector.shape_cast %36 : vector<1x64x64xbf16> to vector<64x64xbf16>
    %cst_44 = arith.constant dense<0.000000e+00> : vector<16x64xf32>
    %38 = tpu.matmul %35, %37, %cst_44 {dimension_numbers = #tpu.dot_dimension_numbers<[1], [0], [0], [1], [0, 0, 1, 1], [], []>} : vector<16x64xbf16>, vector<64x64xbf16>, vector<16x64xf32> -> vector<16x64xf32>
    %39 = arith.addf %34, %38 : vector<16x64xf32>
    %c2_45 = arith.constant 2 : index
    %c0_46 = arith.constant 0 : index
    %40 = vector.load %arg8[%c2_45, %c0_46] : memref<18x64xbf16, #tpu.memory_space<vmem>>, vector<16x64xbf16>
    %c2_47 = arith.constant 2 : index
    %c0_48 = arith.constant 0 : index
    %c0_49 = arith.constant 0 : index
    %41 = vector.load %arg4[%c2_47, %c0_48, %c0_49] : memref<3x64x64xbf16, #tpu.memory_space<vmem>>, vector<1x64x64xbf16>
    %42 = vector.shape_cast %41 : vector<1x64x64xbf16> to vector<64x64xbf16>
    %cst_50 = arith.constant dense<0.000000e+00> : vector<16x64xf32>
    %43 = tpu.matmul %40, %42, %cst_50 {dimension_numbers = #tpu.dot_dimension_numbers<[1], [0], [0], [1], [0, 0, 1, 1], [], []>} : vector<16x64xbf16>, vector<64x64xbf16>, vector<16x64xf32> -> vector<16x64xf32>
    %44 = arith.addf %39, %43 : vector<16x64xf32>
    %c0_51 = arith.constant 0 : index
    %c0_52 = arith.constant 0 : index
    %45 = vector.load %arg5[%c0_51, %c0_52] : memref<1x64xf32, #tpu.memory_space<vmem>>, vector<1x64xf32>
    %46 = vector.broadcast %45 : vector<1x64xf32> to vector<16x64xf32>
    %47 = arith.addf %44, %46 : vector<16x64xf32>
    %48 = arith.addf %47, %7 : vector<16x64xf32>
    %cst_53 = arith.constant 0.000000e+00 : f32
    %49 = vector.broadcast %cst_53 : f32 to vector<16x64xf32>
    %50 = arith.maximumf %48, %49 : vector<16x64xf32>
    %c0_54 = arith.constant 0 : index
    %c0_55 = arith.constant 0 : index
    %c0_56 = arith.constant 0 : index
    %51 = vector.load %arg6[%c0_54, %c0_55, %c0_56] : memref<1x16x64xf32, #tpu.memory_space<vmem>>, vector<1x16x64xf32>
    %52 = vector.shape_cast %51 : vector<1x16x64xf32> to vector<16x64xf32>
    %53 = vector.shape_cast %50 : vector<16x64xf32> to vector<1x16x64xf32>
    tpu.vector_store %arg6[%c0_54, %c0_55, %c0_56], %53 {strides = array<i32>} : memref<1x16x64xf32, #tpu.memory_space<vmem>>, vector<1x16x64xf32>,
    return
  }
  func.func @transform_0(%arg0: i32) -> (i32, i32, i32) {
    %c0_i32 = arith.constant 0 : i32
    %c0_i32_0 = arith.constant 0 : i32
    %c0_i32_1 = arith.constant 0 : i32
    return %arg0, %c0_i32, %c0_i32_0 : i32, i32, i32
  }
  func.func @transform_1(%arg0: i32) -> (i32, i32, i32) {
    %c0_i32 = arith.constant 0 : i32
    %c0_i32_0 = arith.constant 0 : i32
    %c0_i32_1 = arith.constant 0 : i32
    %c0_i32_2 = arith.constant 0 : i32
    return %c0_i32, %c0_i32_0, %c0_i32_1 : i32, i32, i32
  }
  func.func @transform_2(%arg0: i32) -> (i32, i32) {
    %c0_i32 = arith.constant 0 : i32
    %c0_i32_0 = arith.constant 0 : i32
    %c0_i32_1 = arith.constant 0 : i32
    return %c0_i32, %c0_i32_0 : i32, i32
  }
  func.func @transform_3(%arg0: i32) -> (i32, i32, i32) {
    %c0_i32 = arith.constant 0 : i32
    %c0_i32_0 = arith.constant 0 : i32
    %c0_i32_1 = arith.constant 0 : i32
    %c0_i32_2 = arith.constant 0 : i32
    return %c0_i32, %c0_i32_0, %c0_i32_1 : i32, i32, i32
  }
  func.func @transform_4(%arg0: i32) -> (i32, i32) {
    %c0_i32 = arith.constant 0 : i32
    %c0_i32_0 = arith.constant 0 : i32
    %c0_i32_1 = arith.constant 0 : i32
    return %c0_i32, %c0_i32_0 : i32, i32
  }
  func.func @transform_5(%arg0: i32) -> (i32, i32, i32) {
    %c0_i32 = arith.constant 0 : i32
    %c0_i32_0 = arith.constant 0 : i32
    %c0_i32_1 = arith.constant 0 : i32
    return %arg0, %c0_i32, %c0_i32_0 : i32, i32, i32
  }
}

</mosaic_0001>

<bundles_post_ra>
// kernel: tile.13
= control target key start
LH: loop header
LB: loop body
LE: loop exit
PB: predicated region body
PF: predicated region fallthrough
CT: control target
= control target key end

     0   :  { %s28_s0 = inlined_call_operand.vmem [shape: f32[4], index: 0, kind: input, shape index: {}]   ;;  %s29_s1 = inlined_call_operand.vmem [shape: f32[16,4], index: 1, kind: output, shape index: {}]  }
   0x1   :  { %v4_v0 = vld [vmem:[%s28_s0] ss:$0 sm:$0xff] }
   0x2   :  { %5 = vst [vmem:[%s29_s1] sm:$0xff] %v4_v0 }
   0x3   :  { %8 = vst [vmem:[%s29_s1 + $0x8] sm:$0xff] %v4_v0 }

// kernel: tile.14
= control target key start
LH: loop header
LB: loop body
LE: loop exit
PB: predicated region body
PF: predicated region fallthrough
CT: control target
= control target key end

     0   :  { %s131_s10 = smov 60   ;;  %s132_s11 = smov 52   ;;  %vm3_vm0 = vcmask 31744   ;;  %vm9_vm1 = vcmask 523744   ;;  %vm15_vm2 = vcmask 490944   ;;  %vm21_vm3 = vcmask 458144   ;;  %s207_s0 = inlined_call_operand.vmem [shape: f32[16,4], index: 0, kind: input, shape index: {}]   ;;  %s208_s1 = inlined_call_operand.vmem [shape: f32[1,64], index: 1, kind: output, shape index: {}]  }
   0x1   :  { %v101_v0 = vld [vmem:[%s207_s0 + $0xf] sm:$0x1]   ;;  %v103_v1 = vld [vmem:[%s207_s0 + $0xd] sm:$0x1]   ;;  %v105_v2 = vld [vmem:[%s207_s0 + $0xb] sm:$0x1]  }
   0x2   :  { %7 = vrot.lane.b32.xlu0 %v101_v0, %s131_s10  ;;  %19 = vrot.lane.b32.xlu1 %v103_v1, %s132_s11  ;;  %s133_s14 = smov 44   ;;  %v102_v3 = vld [vmem:[%s207_s0 + $0xe] sm:$0x1]   ;;  %v104_v4 = vld [vmem:[%s207_s0 + $0xc] sm:$0x1]   ;;  %s134_s19 = smov 56  }
   0x3   :  { %31 = vrot.lane.b32.xlu2 %v105_v2, %s133_s14  ;;  %s135_s20 = smov 48   ;;  %v106_v5 = vld [vmem:[%s207_s0 + $0xa] sm:$0x1]   ;;  %s136_s23 = smov 40   ;;  %v107_v6 = vld [vmem:[%s207_s0 + $0x9] sm:$0x1]  }
   0x4   :  { %v108_v7 = vld [vmem:[%s207_s0 + $0x8] sm:$0x1]   ;;  %s137_s28 = smov 36   ;;  %s138_s29 = smov 32   ;;  %v109_v8 = vld [vmem:[%s207_s0 + $0x7] sm:$0x1]  }
   0x5   :  { %s139_s3 = smov 28   ;;  %v110_v9 = vld [vmem:[%s207_s0 + $0x6] sm:$0x1]   ;;  %v111_v10 = vld [vmem:[%s207_s0 + $0x5] sm:$0x1]   ;;  %s140_s8 = smov 24  }
   0x6   :  { %s141_s9 = smov 20   ;;  %v112_v11 = vld [vmem:[%s207_s0 + $0x4] sm:$0x1]   ;;  %s142_s12 = smov 16   ;;  %v113_v12 = vld [vmem:[%s207_s0 + $0x3] sm:$0x1]  }
   0x7   :  { %v114_v13 = vld [vmem:[%s207_s0 + $0x2] sm:$0x1]   ;;  %s143_s17 = smov 12   ;;  %s144_s18 = smov 8   ;;  %v115_v14 = vld [vmem:[%s207_s0 + $0x1] sm:$0x1]  }
   0x8   :  { %s145_s21 = smov 4   ;;  %v2_v15 = vld [vmem:[%s207_s0] sm:$0x1]   ;;  %vm27_vm4 = vcmask 425344   ;;  %vm33_vm5 = vcmask 392544   ;;  %vm39_vm6 = vcmask 359744  }
   0x9   :  { %4 = vst.msk [vmem:[#allocation0] sm:$0x1] %vm3_vm0, %v2_v15   ;;  %vm45_vm7 = vcmask 326944   ;;  %vm51_vm8 = vcmask 294144   ;;  %vm57_vm9 = vcmask 261344   ;;  %vm63_vm10 = vcmask 228544  }
   0xa   :  { %13 = vrot.lane.b32.xlu0 %v102_v3, %s134_s19  ;;  %25 = vrot.lane.b32.xlu1 %v104_v4, %s135_s20  ;;  %vm69_vm11 = vcmask 195744   ;;  %vm75_vm12 = vcmask 162944   ;;  %vm81_vm13 = vcmask 130144   ;;  %vm87_vm14 = vcmask 97344  }
   0xb   :  { %37 = vrot.lane.b32.xlu2 %v106_v5, %s136_s23  ;;  %vm93_vm15 = vcmask 64544  }
  0x12   :  { %43 = vrot.lane.b32.xlu0 %v107_v6, %s137_s28  ;;  %49 = vrot.lane.b32.xlu1 %v108_v7, %s138_s29 }
  0x13   :  { %55 = vrot.lane.b32.xlu2 %v109_v8, %s139_s3 }
  0x1a   :  { %61 = vrot.lane.b32.xlu0 %v110_v9, %s140_s8  ;;  %67 = vrot.lane.b32.xlu1 %v111_v10, %s141_s9 }
  0x1b   :  { %73 = vrot.lane.b32.xlu2 %v112_v11, %s142_s12 }
  0x22   :  { %79 = vrot.lane.b32.xlu0 %v113_v12, %s143_s17  ;;  %85 = vrot.lane.b32.xlu1 %v114_v13, %s144_s18 }
  0x23   :  { %91 = vrot.lane.b32.xlu2 %v115_v14, %s145_s21 }
  0x5d   :  { %v32_v16 = vpop.permute.xlu2 %31  }
  0x65   :  { %v38_v17 = vpop.permute.xlu2 %37  }
  0x6d   :  { %v56_v18 = vpop.permute.xlu2 %55  }
  0x74   :  { %v8_v19 = vpop.permute.xlu0 %7   ;;  %v20_v20 = vpop.permute.xlu1 %19  }
  0x75   :  { %10 = vst.msk [vmem:[#allocation0] sm:$0x1] %vm9_vm1, %v8_v19   ;;  %v74_v21 = vpop.permute.xlu2 %73  }
  0x7c   :  { %v14_v22 = vpop.permute.xlu0 %13   ;;  %v26_v23 = vpop.permute.xlu1 %25  }
  0x7d   :  { %16 = vst.msk [vmem:[#allocation0] sm:$0x1] %vm15_vm2, %v14_v22   ;;  %v92_v24 = vpop.permute.xlu2 %91  }
  0x7e   :  { %22 = vst.msk [vmem:[#allocation0] sm:$0x1] %vm21_vm3, %v20_v20  }
  0x7f   :  { %28 = vst.msk [vmem:[#allocation0] sm:$0x1] %vm27_vm4, %v26_v23  }
  0x80   :  { %34 = vst.msk [vmem:[#allocation0] sm:$0x1] %vm33_vm5, %v32_v16  }
  0x81   :  { %40 = vst.msk [vmem:[#allocation0] sm:$0x1] %vm39_vm6, %v38_v17  }
  0x84   :  { %v44_v25 = vpop.permute.xlu0 %43   ;;  %v50_v26 = vpop.permute.xlu1 %49  }
  0x85   :  { %46 = vst.msk [vmem:[#allocation0] sm:$0x1] %vm45_vm7, %v44_v25  }
  0x86   :  { %52 = vst.msk [vmem:[#allocation0] sm:$0x1] %vm51_vm8, %v50_v26  }
  0x87   :  { %58 = vst.msk [vmem:[#allocation0] sm:$0x1] %vm57_vm9, %v56_v18  }
  0x8c   :  { %v62_v27 = vpop.permute.xlu0 %61   ;;  %v68_v28 = vpop.permute.xlu1 %67  }
  0x8d   :  { %64 = vst.msk [vmem:[#allocation0] sm:$0x1] %vm63_vm10, %v62_v27  }
  0x8e   :  { %70 = vst.msk [vmem:[#allocation0] sm:$0x1] %vm69_vm11, %v68_v28  }
  0x8f   :  { %76 = vst.msk [vmem:[#allocation0] sm:$0x1] %vm75_vm12, %v74_v21  }
  0x94   :  { %v80_v29 = vpop.permute.xlu0 %79   ;;  %v86_v30 = vpop.permute.xlu1 %85  }
  0x95   :  { %82 = vst.msk [vmem:[#allocation0] sm:$0x1] %vm81_vm13, %v80_v29  }
  0x96   :  { %88 = vst.msk [vmem:[#allocation0] sm:$0x1] %vm87_vm14, %v86_v30  }
  0x97   :  { %94 = vst.msk [vmem:[#allocation0] sm:$0x1] %vm93_vm15, %v92_v24  }
  0x9e   :  { %v97_v31 = vld [vmem:[#allocation0] sm:$0x1] }
  0x9f   :  { %100 = vst [vmem:[%s208_s1] sm:$0x1] %v97_v31 }

// kernel: basic_block_pallas.1
= control target key start
LH: loop header
LB: loop body
LE: loop exit
PB: predicated region body
PF: predicated region fallthrough
CT: control target
= control target key end

     0   :  { %s979_s18 = smov 0   ;;  %s1146_s0 = inlined_call_operand.vmem [shape: f32[2,16,64], index: 0, kind: input, shape index: {}]   ;;  %s1147_s1 = inlined_call_operand.vmem [shape: bf16[3,64,64], index: 1, kind: input, shape index: {}]   ;;  %s1148_s2 = inlined_call_operand.vmem [shape: f32[1,64], index: 2, kind: input, shape index: {}]   ;;  %s1149_s3 = inlined_call_operand.vmem [shape: bf16[3,64,64], index: 3, kind: input, shape index: {}]   ;;  %s1150_s4 = inlined_call_operand.vmem [shape: f32[1,64], index: 4, kind: input, shape index: {}]   ;;  %s1151_s5 = inlined_call_operand.vmem [shape: f32[2,16,64], index: 5, kind: output, shape index: {}]  }
   0x1 LB: > { %s746_s19 = sadd.s32 4294967295, %s947_s18   ;;  %p750_p0 = scmp.ge.s32.totalorder %s947_s18, 1  ;;  %s947_s18 = sphi %s979_s18, %s15_s18  }
   0x2   : > { %p187_p1 = scmp.lt.s32.totalorder %s947_s18, 3 }
   0x4   : > { %p188_p2 = pnand %p750_p0, %p187_p1 }
   0x5   : > { %p215_p3 = scmp.lt.s32.totalorder (!%p188_p2), %s746_s19, 1 }
   0x6   : > { %191 = sbr.rel (%p188_p2) target bundleno = 367 (0x16f), region = 40 }
   0xb   : > { %v896_v0 = vld [vmem:[%s1147_s1 + $0x18] sm:$0xff]  ;;  %vm226_vm0 = vcmask 516096   ;;  %vm227_vm1 = vsmask.f32 256  ;;  %v895_v3 = vld [vmem:[%s1147_s1 + $0x10] sm:$0xff]  ;;  %s1161_s19 = smov (!%p215_p3, %s746_s19), 1 }
   0xc   : > { %v904_v1 = vld [vmem:[%s1147_s1 + $0x58] sm:$0xff]  ;;  %392 = vmatpush.bf16.msra.mxu1 %v896_v0  ;;  %v903_v4 = vld [vmem:[%s1147_s1 + $0x50] sm:$0xff]  ;;  %vm232_vm2 = vsmask.f32 7938  ;;  %vm1008_vm3 = vmand %vm226_vm0, %vm227_vm1  ;;  %s891_s7 = sshll.u32 %s1161_s19, 4  ;;  %vm269_vm6 = vcmask 519168  }
   0xd   : > { %v900_v2 = vld [vmem:[%s1147_s1 + $0x38] sm:$0xff]  ;;  %450 = vmatpush.bf16.msra.mxu2 %v904_v1  ;;  %v899_v5 = vld [vmem:[%s1147_s1 + $0x30] sm:$0xff]  ;;  %v229_v7 = vld [vmem:[#allocation2] sm:$0x1]  ;;  %s219_s12 = scalar_lea.vmem %s1146_s0, %s891_s7  ;;  %vm247_vm5 = vsmask.f32 4368  ;;  %s224_s9 = scalar_lea.vmem %s1151_s5, %s891_s7 }
   0xe   : > { %352 = vmatpush.bf16.msra.mxu0 %v900_v2  ;;  %v230_v8 = vsel %vm1008_vm3, 0, %v229_v7  ;;  %vm1016_vm4 = vmand %vm226_vm0, %vm232_vm2  ;;  %v234_v10 = vld [vmem:[#allocation2 + $0x8] sm:$0x1]  ;;  %v1033_v14 = vld [vmem:[%s219_s12] sm:$0xff]  ;;  %vm344_vm9 = vcmask 523264   ;;  %vm415_vm10 = vcmask 1046528  }
   0xf   : > { %v894_v11 = vld [vmem:[%s1147_s1 + $0x8] sm:$0xff]  ;;  %231 = vst [vmem:[#allocation2] sm:$0x1] %v230_v8  ;;  %v235_v12 = vsel %vm1016_vm4, 0, %v234_v10  ;;  %v245_v17 = vpack.c.bf16 %v1033_v14, %v1033_v14  ;;  %v893_v23 = vld [vmem:[%s1147_s1] sm:$0xff]  ;;  %vm1051_vm7 = vmor %vm227_vm1, %vm247_vm5 }
  0x10   : > { %393 = vmatpush.bf16.msra.mxu1 %v895_v3  ;;  %v902_v13 = vld [vmem:[%s1147_s1 + $0x48] sm:$0xff]  ;;  %236 = vst [vmem:[#allocation2 + $0x8] sm:$0x1] %v235_v12  ;;  %v901_v24 = vld [vmem:[%s1147_s1 + $0x40] sm:$0xff]  ;;  %vm1060_vm8 = vmand %vm269_vm6, %vm232_vm2  ;;  %vm307_vm11 = vsmask.f32 7424 }
  0x11   : > { %451 = vmatpush.bf16.msra.mxu2 %v903_v4  ;;  %v1035_v15 = vld [vmem:[%s219_s12 + $0x8] sm:$0xff]  ;;  %v250_v19 = vshrl.u32 %v245_v17, 16  ;;  %v253_v20 = vshll.u32 %v245_v17, 16  ;;  %v897_v28 = vld [vmem:[%s1147_s1 + $0x20] sm:$0xff]  ;;  %v240_v58 = vld [vmem:[#allocation3 + $0x8] sm:$0x1] }
  0x12   : > { %353 = vmatpush.bf16.msra.mxu0 %v899_v5  ;;  %v898_v16 = vld [vmem:[%s1147_s1 + $0x28] sm:$0xff]  ;;  %v246_v18 = vpack.c.bf16 %v1035_v15, %v1035_v15  ;;  %v241_v59 = vsel %vm1016_vm4, 0, %v240_v58  ;;  %v908_v60 = vld [vmem:[%s1149_s3 + $0x18] sm:$0xff]  ;;  %v907_v61 = vld [vmem:[%s1149_s3 + $0x10] sm:$0xff] }
  0x13   : > { %v252_v26 = vrot.slane %v250_v19, 7  ;;  %v237_v56 = vld [vmem:[#allocation3] sm:$0x1]  ;;  %242 = vst [vmem:[#allocation3 + $0x8] sm:$0x1] %v241_v59  ;;  %v916_v62 = vld [vmem:[%s1149_s3 + $0x58] sm:$0xff] }
  0x14   : > { %v258_v21 = vshrl.u32 %v246_v18, 16  ;;  %v261_v22 = vshll.u32 %v246_v18, 16  ;;  %394 = vmatpush.bf16.msra.mxu1 %v894_v11  ;;  %v238_v57 = vsel %vm1008_vm3, 0, %v237_v56  ;;  %v906_v63 = vld [vmem:[%s1149_s3 + $0x8] sm:$0xff]  ;;  %v912_v0 = vld [vmem:[%s1149_s3 + $0x38] sm:$0xff]  ;;  %v915_v1 = vld [vmem:[%s1149_s3 + $0x50] sm:$0xff] }
  0x15   : > { %452 = vmatpush.bf16.msra.mxu2 %v902_v13  ;;  %v255_v31 = vor.u32 %v253_v20, %v252_v26  ;;  %v256_v32 = vrot.slane %v252_v26, 4  ;;  %239 = vst [vmem:[#allocation3] sm:$0x1] %v238_v57  ;;  %v905_v2 = vld [vmem:[%s1149_s3] sm:$0xff]  ;;  %570 = vmatpush.bf16.msra.mxu3 %v912_v0  ;;  %v911_v3 = vld [vmem:[%s1149_s3 + $0x30] sm:$0xff]  ;;  %v914_v9 = vld [vmem:[%s1149_s3 + $0x48] sm:$0xff] }
  0x16   : > { %354 = vmatpush.bf16.msra.mxu0 %v898_v16  ;;  %v260_v27 = vrot.slane %v258_v21, 7  ;;  %v271_v30 = vld [vmem:[#allocation2] sm:$0xf]  ;;  %v910_v12 = vld [vmem:[%s1149_s3 + $0x28] sm:$0xff] }
  0x17   : > { %v276_v35 = vld [vmem:[#allocation2 + $0x8] sm:$0x1]  ;;  %v272_v37 = vsel %vm1060_vm8, %v255_v31, %v271_v30  ;;  %v939_v8 = vld [vmem:[%s1148_s2] ss:$0 sm:$0xff] }
  0x18   : > { %v263_v33 = vor.u32 %v261_v22, %v260_v27  ;;  %v265_v34 = vrot.slane %v260_v27, 4  ;;  %395 = vmatpush.bf16.msra.mxu1 %v893_v23  ;;  %273 = vst [vmem:[#allocation2] sm:$0xf] %v272_v37  ;;  %v913_v13 = vld [vmem:[%s1149_s3 + $0x40] sm:$0xff] }
  0x19   : > { %453 = vmatpush.bf16.msra.mxu2 %v901_v24  ;;  %571 = vmatpush.bf16.msra.mxu3 %v911_v3  ;;  %v909_v17 = vld [vmem:[%s1149_s3 + $0x20] sm:$0xff] }
  0x1a   : > { %v264_v36 = vsel %vm1051_vm7, %v256_v32, %v263_v33  ;;  %v277_v38 = vsel %vm1008_vm3, %v265_v34, %v276_v35  ;;  %355 = vmatpush.bf16.msra.mxu0 %v897_v28 }
  0x1b   : > { %275 = vst.msk [vmem:[#allocation2 + $0x4] sm:$0xf] %vm269_vm6, %v264_v36 }
  0x1c   : > { %278 = vst [vmem:[#allocation2 + $0x8] sm:$0x1] %v277_v38  ;;  %667 = vmatpush.bf16.msrb.mxu1 %v916_v62  ;;  %v492_v31 = vld [vmem:[#allocation3] sm:$0xf] }
  0x1d   : > { %572 = vmatpush.bf16.msra.mxu3 %v910_v12 }
  0x1e   : > { %610 = vmatpush.bf16.msrb.mxu0 %v908_v60 }
  0x1f   : > { %v926_v39 = vld [vmem:[#allocation2] sm:$0xe] }
  0x20   : > { %668 = vmatpush.bf16.msrb.mxu1 %v915_v1 }
  0x21   : > { %573 = vmatpush.bf16.msra.mxu3 %v909_v17 }
  0x22   : > { %v918_v40 = vld [vmem:[#allocation2] sm:$0xff]   ;;  %611 = vmatpush.bf16.msrb.mxu0 %v907_v61 }
  0x23   : > { %v925_v41 = vld [vmem:[#allocation2] sm:$0xf0]  ;;  %v311_v42 = vshll.u32 %v918_v40, 16  ;;  %796 = vmatmul.msk.bf16.vlgmr.msra.gmra.mxu1 %vm344_vm9, %v918_v40  ;;  %v289_v43 = vld [vmem:[#allocation2 + $0x8] sm:$0x1]  ;;  %v309_v45 = vshrl.u32 %v918_v40, 16 }
  0x24   : > { %v927_v44 = vor.u32 %v926_v39, %v925_v41  ;;  %v304_v46 = vunpack.c.l.b16 %v289_v43  ;;  %669 = vmatpush.bf16.msrb.mxu1 %v914_v9  ;;  %v496_v39 = vld [vmem:[#allocation3 + $0x8] sm:$0x1] }
  0x25   : > { %v313_v47 = vrot.slane %v311_v42, 1 }
  0x26   : > { %v306_v48 = vpack.c.b16 %v304_v46, %v304_v46  ;;  %v416_v49 = vrot.slane %v927_v44, 1  ;;  %612 = vmatpush.bf16.msrb.mxu0 %v906_v63  ;;  %v940_v63 = vld [vmem:[%s1150_s4] ss:$0 sm:$0xff] }
  0x27   : > { %v314_v50 = vor.u32 %v313_v47, %v309_v45 }
  0x28   : > { %v417_v51 = vrot.slane %v306_v48, 1  ;;  %v316_v52 = vshll.u32 %v306_v48, 16  ;;  %670 = vmatpush.bf16.msrb.mxu1 %v913_v13 }
  0x2a   : > { %v418_v53 = vsel %vm415_vm10, %v416_v49, %v417_v51  ;;  %v318_v54 = vrot.slane %v316_v52, 1  ;;  %613 = vmatpush.bf16.msrb.mxu0 %v905_v2 }
  0x2b   : > { %821 = vmatmul.msk.bf16.vlgmr.msra.gmra.mxu2 %vm344_vm9, %v418_v53 }
  0x2c   : > { %v319_v55 = vsel %vm307_vm11, %v314_v50, %v318_v54 }
  0x2d   : > { %779 = vmatmul.msk.bf16.vlgmr.msra.gmra.mxu0 %vm344_vm9, %v319_v55 }
  0xa0   : > { %v397_v4 = vpop.f32.mrf.mxu1 }
  0xa8   : > { %v399_v20 = vpop.f32.mrf.mxu1 }
  0xaa   : > { %v357_v5 = vpop.f32.mrf.mxu0 }
  0xab   : > { %v398_v7 = vadd.f32 %v397_v4, %v357_v5 }
  0xae   : > { %v455_v10 = vpop.f32.mrf.mxu2 }
  0xaf   : > { %v460_v11 = vadd.f32 %v455_v10, %v398_v7 }
  0xb1   : > { %v466_v16 = vadd.f32 %v939_v8, %v460_v11 }
  0xb2   : > { %v359_v18 = vpop.f32.mrf.mxu0 }
  0xb3   : > { %v468_v19 = vmax.f32 %v466_v16, 0.0  ;;  %v400_v22 = vadd.f32 %v399_v20, %v359_v18 }
  0xb5   : > { %v470_v21 = vpack.c.bf16 %v468_v19, %v468_v19 }
  0xb6   : > { %v457_v23 = vpop.f32.mrf.mxu2 }
  0xb7   : > { %v473_v24 = vshrl.u32 %v470_v21, 16  ;;  %v461_v26 = vadd.f32 %v457_v23, %v400_v22  ;;  %v476_v28 = vshll.u32 %v470_v21, 16 }
  0xb9   : > { %v475_v27 = vrot.slane %v473_v24, 7  ;;  %v467_v30 = vadd.f32 %v939_v8, %v461_v26 }
  0xbb   : > { %v478_v32 = vor.u32 %v476_v28, %v475_v27  ;;  %v469_v33 = vmax.f32 %v467_v30, 0.0  ;;  %v479_v40 = vrot.slane %v475_v27, 4 }
  0xbd   : > { %v493_v34 = vsel %vm1060_vm8, %v478_v32, %v492_v31  ;;  %v471_v35 = vpack.c.bf16 %v469_v33, %v469_v33 }
  0xbe   : > { %494 = vst [vmem:[#allocation3] sm:$0xf] %v493_v34 }
  0xbf   : > { %v481_v36 = vshrl.u32 %v471_v35, 16  ;;  %v484_v38 = vshll.u32 %v471_v35, 16 }
  0xc1   : > { %v483_v37 = vrot.slane %v481_v36, 7 }
  0xc3   : > { %v486_v41 = vor.u32 %v484_v38, %v483_v37  ;;  %v488_v42 = vrot.slane %v483_v37, 4 }
  0xc5   : > { %v487_v43 = vsel %vm1051_vm7, %v479_v40, %v486_v41  ;;  %v497_v44 = vsel %vm1008_vm3, %v488_v42, %v496_v39  ;;  %v929_v48 = vld [vmem:[#allocation3] sm:$0xe] }
  0xc6   : > { %495 = vst.msk [vmem:[#allocation3 + $0x4] sm:$0xf] %vm269_vm6, %v487_v43 }
  0xc7   : > { %498 = vst [vmem:[#allocation3 + $0x8] sm:$0x1] %v497_v44 }
  0xcd   : > { %v922_v29 = vld [vmem:[#allocation3] sm:$0xff]  }
  0xce   : > { %v928_v45 = vld [vmem:[#allocation3] sm:$0xf0]  ;;  %v530_v46 = vshll.u32 %v922_v29, 16  ;;  %863 = vmatmul.msk.bf16.vlgmr.msrb.gmra.mxu0 %vm344_vm9, %v922_v29  ;;  %v509_v47 = vld [vmem:[#allocation3 + $0x8] sm:$0x1]  ;;  %v528_v53 = vshrl.u32 %v922_v29, 16 }
  0xcf   : > { %v524_v49 = vunpack.c.l.b16 %v509_v47  ;;  %v930_v50 = vor.u32 %v929_v48, %v928_v45 }
  0xd0   : > { %v532_v51 = vrot.slane %v530_v46, 1 }
  0xd1   : > { %v526_v52 = vpack.c.b16 %v524_v49, %v524_v49  ;;  %v633_v25 = vrot.slane %v930_v50, 1 }
  0xd2   : > { %v533_v56 = vor.u32 %v532_v51, %v528_v53 }
  0xd3   : > { %v634_v54 = vrot.slane %v526_v52, 1  ;;  %v535_v55 = vshll.u32 %v526_v52, 16 }
  0xd5   : > { %v635_v6 = vsel %vm415_vm10, %v633_v25, %v634_v54  ;;  %v537_v57 = vrot.slane %v535_v55, 1 }
  0xd6   : > { %888 = vmatmul.msk.bf16.vlgmr.msrb.gmra.mxu1 %vm344_vm9, %v635_v6 }
  0xd7   : > { %v538_v58 = vsel %vm307_vm11, %v533_v56, %v537_v57 }
  0xd8   : > { %846 = vmatmul.msk.bf16.vlgmr.msra.gmra.mxu3 %vm344_vm9, %v538_v58 }
 0x14b   : > { %v615_v59 = vpop.f32.mrf.mxu0 }
 0x153   : > { %v672_v60 = vpop.f32.mrf.mxu1  ;;  %v617_v3 = vpop.f32.mrf.mxu0 }
 0x15b   : > { %v575_v61 = vpop.f32.mrf.mxu3  ;;  %v674_v8 = vpop.f32.mrf.mxu1 }
 0x15c   : > { %v616_v62 = vadd.f32 %v615_v59, %v575_v61 }
 0x15e   : > { %v677_v0 = vadd.f32 %v672_v60, %v616_v62 }
 0x160   : > { %v683_v1 = vadd.f32 %v940_v63, %v677_v0 }
 0x162   : > { %v685_v2 = vadd.f32 %v683_v1, %v1033_v14 }
 0x163   : > { %v577_v4 = vpop.f32.mrf.mxu3 }
 0x164   : > { %v687_v5 = vmax.f32 %v685_v2, 0.0  ;;  %v618_v7 = vadd.f32 %v617_v3, %v577_v4 }
 0x166   : > { %689 = vst.msk [vmem:[%s224_s9] sm:$0xff] %vm344_vm9, %v687_v5  ;;  %v678_v9 = vadd.f32 %v674_v8, %v618_v7 }
 0x168   : > { %v684_v10 = vadd.f32 %v940_v63, %v678_v9 }
 0x16a   : > { %v686_v11 = vadd.f32 %v684_v10, %v1035_v15 }
 0x16c   : > { %v688_v12 = vmax.f32 %v686_v11, 0.0 }
 0x16e   : > { %690 = vst.msk [vmem:[%s224_s9 + $0x8] sm:$0xff] %vm344_vm9, %v688_v12 }
 0x16f PF: > { %s15_s18 = sadd.s32 1, %s947_s18  }
 0x170   : > { %p12_p4 = scmp.ge.s32.totalorder %s15_s18, 4  }
 0x172   :  { %14 = sbr.rel (!%p12_p4) target bundleno = 1 (0x1), region = 74 }

</bundles_post_ra>
